<compile_context>
chip_gen: v5e
topology: v5e:2x2
jax: 0.10.0
libtpu: 0.0.40
codegen_flags: <defaults>
</compile_context>

<pallas_src>
import jax
import jax.numpy as jnp
from jax.experimental import pallas as pl
from jax.experimental.pallas import tpu as pltpu


def _embed_head_kernel(w_ref, p_ref, loc_ref, o_ref):
    # w_ref  : (Cout, K)    fused conv weights (tap-major, cin-minor) + bias column
    # p_ref  : (1, K, T)    im2col patches (+ ones row) for one image; spatial on lanes
    # loc_ref: (2, T)       location map rows (x, y), already divided by 100
    # o_ref  : (1, Cout, T) output tile, Cout on sublanes, spatial on lanes (lane-dense)
    Cout = o_ref.shape[1]
    T = o_ref.shape[2]

    # Single fused 3x3-conv matmul on the MXU (bias folded into the last column of w).
    acc = jnp.dot(w_ref[...], p_ref[0],
                  preferred_element_type=jnp.float32)          # (Cout, T)

    # Add the location map to channels 0 (x) and 1 (y) only, via a sublane-index select.
    row = jax.lax.broadcasted_iota(jnp.int32, (Cout, T), 0)
    loc_x = jnp.broadcast_to(loc_ref[0:1, :], (Cout, T))
    loc_y = jnp.broadcast_to(loc_ref[1:2, :], (Cout, T))
    loc = jnp.where(row == 0, loc_x, jnp.where(row == 1, loc_y, 0.0))

    o_ref[0] = (acc + loc).astype(o_ref.dtype)


def embed_head_forward(x_nchw, w_spatial, b_spatial, w_free, b_free, stride):
    """Pallas implementation of EmbedHead.forward.

    Args:
      x_nchw:    (N, Cin, H, W) float32 input (PyTorch NCHW convention).
      w_spatial: (2, Cin, 3, 3), b_spatial: (2,)
      w_free:    (embed_dim-2, Cin, 3, 3), b_free: (embed_dim-2,)
      stride:    python int.
    Returns:
      (N, embed_dim, H, W) float32 output (NCHW, same as the PyTorch module).
    """
    N, Cin, H, W = x_nchw.shape
    Cout = w_spatial.shape[0] + w_free.shape[0]
    HW = H * W
    LANE = 128

    # ---- spatial tile size (lane axis), padded flat-spatial extent ----
    T = 512 if HW >= 512 else ((HW + LANE - 1) // LANE) * LANE
    HWp = ((HW + T - 1) // T) * T
    n_tiles = HWp // T

    # ---- glue (plain JAX): im2col, weight fusion, bias fold, location map ----
    x = x_nchw.astype(jnp.float32)
    xp = jnp.pad(x, ((0, 0), (0, 0), (1, 1), (1, 1)))            # (N, Cin, H+2, W+2)
    taps = []
    for dy in range(3):
        for dx in range(3):
            taps.append(xp[:, :, dy:dy + H, dx:dx + W])          # (N, Cin, H, W)
    patches = jnp.stack(taps, axis=1).reshape(N, 9 * Cin, HW)    # tap-major, cin-minor
    ones = jnp.ones((N, 1, HW), jnp.float32)                     # bias column of im2col
    patches = jnp.concatenate([patches, ones], axis=1)           # (N, K, HW)
    K = 9 * Cin + 1
    if HWp > HW:
        patches = jnp.pad(patches, ((0, 0), (0, 0), (0, HWp - HW)))

    w = jnp.concatenate([w_spatial, w_free], axis=0).astype(jnp.float32)   # (Cout,Cin,3,3)
    w2 = jnp.transpose(w, (0, 2, 3, 1)).reshape(Cout, 9 * Cin)             # tap-major
    b = jnp.concatenate([b_spatial, b_free], axis=0).astype(jnp.float32)
    w2b = jnp.concatenate([w2, b[:, None]], axis=1)                        # (Cout, K)

    shifts_x = jnp.arange(0, W * stride, step=stride, dtype=jnp.float32)
    shifts_y = jnp.arange(0, H * stride, step=stride, dtype=jnp.float32)
    shift_y, shift_x = jnp.meshgrid(shifts_y, shifts_x, indexing="ij")     # (H, W)
    loc = jnp.stack([shift_x, shift_y], axis=0) + float(stride // 2)       # (2, H, W)
    loc = (loc / 100.0).reshape(2, HW)
    if HWp > HW:
        loc = jnp.pad(loc, ((0, 0), (0, HWp - HW)))                        # (2, HWp)

    # ---- explicit VMEM budget for the chosen tiles (double-buffered) ----
    Kp = ((K + 7) // 8) * 8
    Coutp = ((Cout + 7) // 8) * 8
    vmem_limit = int(
        2 * 4 * T * (Kp + Coutp + 8)            # patches + out + loc tiles, x2 buffers
        + 4 * Coutp * (((K + 127) // 128) * 128)  # resident fused weights
    ) + (4 << 20)                                # headroom
    vmem_limit = min(vmem_limit, 100 * 1024 * 1024)

    # ---- hot path: one MXU matmul per (batch, spatial-tile) grid step ----
    out = pl.pallas_call(
        _embed_head_kernel,
        out_shape=jax.ShapeDtypeStruct((N, Cout, HWp), jnp.float32),
        grid_spec=pltpu.PrefetchScalarGridSpec(
            num_scalar_prefetch=0,
            grid=(N, n_tiles),
            in_specs=[
                pl.BlockSpec((Cout, K), lambda n, j: (0, 0)),      # fused weights+bias
                pl.BlockSpec((1, K, T), lambda n, j: (n, 0, j)),   # im2col patches
                pl.BlockSpec((2, T), lambda n, j: (0, j)),         # location map (x, y)
            ],
            out_specs=pl.BlockSpec((1, Cout, T), lambda n, j: (n, 0, j)),
        ),
        compiler_params=pltpu.CompilerParams(
            dimension_semantics=("parallel", "parallel"),
            vmem_limit_bytes=vmem_limit,
        ),
    )(w2b, patches, loc)

    out = out[:, :, :HW].reshape(N, Cout, H, W)                    # crop lane padding
    return out


def _reference_nchw(x_nchw, w_spatial, b_spatial, w_free, b_free, stride):
    """Pure-JAX reference reproducing the PyTorch forward (NCHW)."""
    N, Cin, H, W = x_nchw.shape
    w = jnp.concatenate([w_spatial, w_free], axis=0)
    b = jnp.concatenate([b_spatial, b_free], axis=0)
    out = jax.lax.conv_general_dilated(
        x_nchw, w, window_strides=(1, 1), padding="SAME",
        dimension_numbers=("NCHW", "OIHW", "NCHW"))
    out = out + b[None, :, None, None]
    shifts_x = jnp.arange(0, W * stride, step=stride, dtype=jnp.float32)
    shifts_y = jnp.arange(0, H * stride, step=stride, dtype=jnp.float32)
    shift_y, shift_x = jnp.meshgrid(shifts_y, shifts_x, indexing="ij")
    loc = (jnp.stack([shift_x, shift_y], axis=0) + float(stride // 2)) / 100.0  # (2,H,W)
    out = out.at[:, :2].add(loc[None])
    return out


if __name__ == "__main__":
    key = jax.random.PRNGKey(0)
    N, Cin, H, W = 2, 4, 16, 16
    embed_dim = 8
    stride = 8

    k1, k2, k3 = jax.random.split(key, 3)
    x = jax.random.normal(k1, (N, Cin, H, W), dtype=jnp.float32)
    # torch.nn.init.normal_(std=0.01), constant_(bias, 0)
    w_spatial = 0.01 * jax.random.normal(k2, (2, Cin, 3, 3), dtype=jnp.float32)
    b_spatial = jnp.zeros((2,), jnp.float32)
    w_free = 0.01 * jax.random.normal(k3, (embed_dim - 2, Cin, 3, 3), dtype=jnp.float32)
    b_free = jnp.zeros((embed_dim - 2,), jnp.float32)

    got = embed_head_forward(x, w_spatial, b_spatial, w_free, b_free, stride)
    got = jax.block_until_ready(got)

    ref = _reference_nchw(x, w_spatial, b_spatial, w_free, b_free, stride)
    assert got.shape == (N, embed_dim, H, W)
    assert jnp.allclose(got, ref, atol=1e-5, rtol=1e-5), "mismatch vs reference"

    print("KERNEL_OK")
</pallas_src>

<mosaic_0001>
module attributes {stable_mosaic.version = 11 : i64} {
  func.func @_embed_head_kernel(%arg0: i32, %arg1: i32, %arg2: memref<8x37xf32, #tpu.memory_space<vmem>>, %arg3: memref<1x37x256xf32, #tpu.memory_space<vmem>>, %arg4: memref<2x256xf32, #tpu.memory_space<vmem>>, %arg5: memref<1x8x256xf32, #tpu.memory_space<vmem>>) attributes {dimension_semantics = [#tpu.dimension_semantics<parallel>, #tpu.dimension_semantics<parallel>], iteration_bounds = array<i64: 2, 1>, scalar_prefetch = 0 : i64, scratch_operands = 0 : i64, tpu.core_type = #tpu.core_type<tc>, window_params = [{pipeline_mode = #tpu.pipeline_mode<synchronous>, transform_indices = @transform_0, window_bounds = array<i64: 8, 37>}, {transform_indices = @transform_1, window_bounds = array<i64: 1, 37, 256>}, {transform_indices = @transform_2, window_bounds = array<i64: 2, 256>}, {transform_indices = @transform_3, window_bounds = array<i64: 1, 8, 256>}]} {
    %c0 = arith.constant 0 : index
    %c0_0 = arith.constant 0 : index
    %0 = vector.load %arg2[%c0, %c0_0] : memref<8x37xf32, #tpu.memory_space<vmem>>, vector<8x37xf32>
    %c0_1 = arith.constant 0 : index
    %c0_2 = arith.constant 0 : index
    %c0_3 = arith.constant 0 : index
    %1 = vector.load %arg3[%c0_1, %c0_2, %c0_3] : memref<1x37x256xf32, #tpu.memory_space<vmem>>, vector<1x37x256xf32>
    %2 = vector.shape_cast %1 : vector<1x37x256xf32> to vector<37x256xf32>
    %cst = arith.constant dense<0.000000e+00> : vector<8x256xf32>
    %3 = tpu.matmul %0, %2, %cst {dimension_numbers = #tpu.dot_dimension_numbers<[1], [0], [0], [1], [0, 0, 1, 1], [], []>} : vector<8x37xf32>, vector<37x256xf32>, vector<8x256xf32> -> vector<8x256xf32>
    %4 = tpu.iota {dimensions = array<i32: 0>} : vector<8x256xi32>
    %c0_4 = arith.constant 0 : index
    %c0_5 = arith.constant 0 : index
    %5 = vector.load %arg4[%c0_4, %c0_5] : memref<2x256xf32, #tpu.memory_space<vmem>>, vector<1x256xf32>
    %6 = vector.shape_cast %5 : vector<1x256xf32> to vector<1x256xf32>
    %7 = vector.broadcast %6 : vector<1x256xf32> to vector<8x256xf32>
    %c1 = arith.constant 1 : index
    %c0_6 = arith.constant 0 : index
    %8 = vector.load %arg4[%c1, %c0_6] : memref<2x256xf32, #tpu.memory_space<vmem>>, vector<1x256xf32>
    %9 = vector.shape_cast %8 : vector<1x256xf32> to vector<1x256xf32>
    %10 = vector.broadcast %9 : vector<1x256xf32> to vector<8x256xf32>
    %c0_i32 = arith.constant 0 : i32
    %11 = vector.broadcast %c0_i32 : i32 to vector<8x256xi32>
    %12 = arith.cmpi eq, %4, %11 : vector<8x256xi32>
    %c1_i32 = arith.constant 1 : i32
    %13 = vector.broadcast %c1_i32 : i32 to vector<8x256xi32>
    %14 = arith.cmpi eq, %4, %13 : vector<8x256xi32>
    %cst_7 = arith.constant 0.000000e+00 : f32
    %15 = vector.broadcast %cst_7 : f32 to vector<8x256xf32>
    %16 = arith.select %14, %10, %15 : vector<8x256xi1>, vector<8x256xf32>
    %17 = arith.select %12, %7, %16 : vector<8x256xi1>, vector<8x256xf32>
    %18 = arith.addf %3, %17 : vector<8x256xf32>
    %c0_8 = arith.constant 0 : index
    %c0_9 = arith.constant 0 : index
    %c0_10 = arith.constant 0 : index
    %19 = vector.load %arg5[%c0_8, %c0_9, %c0_10] : memref<1x8x256xf32, #tpu.memory_space<vmem>>, vector<1x8x256xf32>
    %20 = vector.shape_cast %19 : vector<1x8x256xf32> to vector<8x256xf32>
    %21 = vector.shape_cast %18 : vector<8x256xf32> to vector<1x8x256xf32>
    tpu.vector_store %arg5[%c0_8, %c0_9, %c0_10], %21 {strides = array<i32>} : memref<1x8x256xf32, #tpu.memory_space<vmem>>, vector<1x8x256xf32>,
    return
  }
  func.func @transform_0(%arg0: i32, %arg1: i32) -> (i32, i32) {
    %c0_i32 = arith.constant 0 : i32
    %c0_i32_0 = arith.constant 0 : i32
    %c0_i32_1 = arith.constant 0 : i32
    return %c0_i32, %c0_i32_0 : i32, i32
  }
  func.func @transform_1(%arg0: i32, %arg1: i32) -> (i32, i32, i32) {
    %c0_i32 = arith.constant 0 : i32
    %c0_i32_0 = arith.constant 0 : i32
    return %arg0, %c0_i32, %arg1 : i32, i32, i32
  }
  func.func @transform_2(%arg0: i32, %arg1: i32) -> (i32, i32) {
    %c0_i32 = arith.constant 0 : i32
    %c0_i32_0 = arith.constant 0 : i32
    return %c0_i32, %arg1 : i32, i32
  }
  func.func @transform_3(%arg0: i32, %arg1: i32) -> (i32, i32, i32) {
    %c0_i32 = arith.constant 0 : i32
    %c0_i32_0 = arith.constant 0 : i32
    return %arg0, %c0_i32, %arg1 : i32, i32, i32
  }
}

</mosaic_0001>

<bundles_post_ra>
// kernel: tpu_custom_call.1
= control target key start
LH: loop header
LB: loop body
LE: loop exit
PB: predicated region body
PF: predicated region fallthrough
CT: control target
= control target key end

     0   :  { %8 = vsyncpa [#allocation3], 0  ;;  %s698_s0 = inlined_call_operand.vmem [shape: f32[8,37], index: 0, kind: input, shape index: {}]   ;;  %s699_s1 = inlined_call_operand.vmem [shape: f32[2,37,256], index: 1, kind: input, shape index: {}]   ;;  %s700_s2 = inlined_call_operand.vmem [shape: f32[2,256], index: 2, kind: input, shape index: {}]   ;;  %s701_s3 = inlined_call_operand.hbm [shape: f32[2,8,256], index: 3, kind: output, shape index: {}]  }
   0x1   :  { %10 = vsyncpa [#allocation3 + $0x1], 0  ;;  %s592_s12 = smov 0   ;;  %s594_s13 = smov 0  }
   0x2   :  { %s596_s14 = smov 0   ;;  %s598_s15 = smov 0  }
   0x3   :  { %s600_s16 = smov 0   ;;  %s602_s17 = smov 0  }
   0x4 LB: > { %s417_s18 = sadd.s32 4294967295, %s570_s17   ;;  %s418_s19 = sadd.s32 4294967294, %s570_s17   ;;  %s570_s17 = sphi %s602_s17, %s16_s17   ;;  %s566_s16 = sphi %s600_s16, %s708_s16   ;;  %s562_s15 = sphi %s598_s15, %s707_s15   ;;  %s558_s14 = sphi %s596_s14, %s706_s14   ;;  %s554_s13 = sphi %s594_s13, %s705_s13   ;;  %s550_s12 = sphi %s592_s12, %s704_s12  }
   0x5   : > { %s28_s20 = sadd.s32 1, %s566_s16  ;;  %s112_s21 = sadd.s32 1, %s558_s14 }
   0x6   : > { %p30_p0 = scmp.ge.s32.totalorder %s28_s20, 2  ;;  %p122_p1 = scmp.ne.s32.totalorder %s558_s14, %s554_s13 }
   0x7   : > { %p123_p2 = scmp.eq.s32.totalorder %s417_s18, 1  ;;  %p128_p3 = scmp.ne.s32.totalorder %s554_s13, %s550_s12 }
   0x8   : > { %s710_s20 = smov (%p30_p0, %s28_s20), 0  ;;  %p129_p5 = scmp.eq.s32.totalorder %s418_s19, 1 }
   0x9   : > { %p632_p4 = por %p123_p2, %p122_p1  ;;  %s107_s23 = ssub.s32 %s566_s16, %s710_s20 }
   0xa   : > { %p422_p6 = scmp.ge.s32.totalorder %s570_s17, 1  ;;  %p110_p7 = scmp.eq.s32.totalorder %s107_s23, 0 }
   0xb   : > { %p639_p8 = por %p129_p5, %p128_p3  ;;  %p172_p9 = scmp.lt.s32.totalorder %s570_s17, 3 }
   0xc   : > { %s645_s25 = scalar_select %p110_p7, %s558_s14, %s112_s21  }
   0xd   : > { %p173_p10 = pnand %p422_p6, %p172_p9 }
   0xe   : > { %p206_p11 = scmp.lt.s32.totalorder (!%p173_p10), %s562_s15, 1  ;;  %s202_s8 = sand.u32 (!%p173_p10), 1, %s554_s13  }
   0xf   : > { %176 = sbr.rel (%p173_p10) target bundleno = 167 (0xa7), region = 32  ;;  %s423_s11 = sshll.u32 (!%p173_p10), %s202_s8, 4 }
  0x10   : > { %s435_s18 = sshll.u32 (!%p173_p10), %s562_s15, 4  ;;  %s512_s6 = scalar_lea.hbm (!%p173_p10), %s701_s3, 32 }
  0x11   : > { %s321_s23 = scalar_lea.hbm (!%p173_p10), %s701_s3, %s435_s18 }
  0x12   : > { %s325_s28 = sshll.u32 (!%p173_p10), %s321_s23, 4  ;;  %s326_s28 = int_to_ptr.hbm [resolvable:$true] %s325_s28 }
  0x13   : > { %s506_s29 = sshra.s32 (!%p173_p10), %s326_s28, 4  ;;  %s507_s29 = int_to_ptr.hbm [resolvable:$true] %s506_s29 }
  0x14   : > { %s207_s26 = scalar_select %p206_p11, %s562_s15, 1  ;;  %vm258_vm0 = vcmask 1044480   ;;  %v222_v10 = vld [vmem:[%s698_s0] sm:$0xff]  ;;  %vm254_vm1 = vcmask 302080   ;;  %v233_v11 = vlaneseq }
  0x15   : > { %v425_v13 = vld [vmem:[%s700_s2 + $0x1] ss:$2 sm:$0x3]  ;;  %v235_v14 = vld [vmem:[%s700_s2] ss:$2 sm:$0x3]  ;;  %p513_p1 = scmp.lt.s32.totalorder %s507_s29, %s701_s3 }
  0x16   : > { %s436_s27 = smul.u32 80, %s207_s26  ;;  %v234_v12 = vshrl.u32 %v233_v11, 7  ;;  %v244_v15 = vperm.slane %v425_v13, 0  ;;  %v245_v16 = vperm.slane %v425_v13, 1  ;;  %v237_v17 = vperm.slane %v235_v14, 0  ;;  %s204_s26 = scalar_lea.vmem [#allocation2], %s423_s11 }
  0x17   : > { %v238_v18 = vperm.slane %v235_v14, 1  ;;  %s308_s15 = scalar_lea.sflag [#allocation3], %s202_s8 }
  0x18   : > { %s213_s30 = scalar_lea.vmem %s699_s1, %s436_s27  ;;  %vm249_vm2 = vcmp.eq.s32.totalorder %v234_v12, 1  ;;  %vm248_vm3 = vcmp.eq.s32.totalorder %v234_v12, 0  ;;  %s323_s27 = sshll.u32 %s204_s26, 4  ;;  %s324_s27 = int_to_ptr.vmem [resolvable:$true] %s323_s27 }
  0x19   : > { %v231_v0 = vld [vmem:[%s213_s30 + $0x40] sm:$0x1f]  ;;  %v232_v1 = vld [vmem:[%s213_s30 + $0x48] sm:$0x1f]  ;;  %v229_v2 = vld [vmem:[%s213_s30 + $0x30] sm:$0xff]  ;;  %v250_v19 = vsel %vm249_vm2, %v244_v15, 0.0 }
  0x1a   : > { %426 = vmatpush.msk.msra.mxu0 %vm258_vm0, %v231_v0  ;;  %428 = vmatpush.msk.msra.mxu1 %vm258_vm0, %v232_v1  ;;  %v230_v3 = vld [vmem:[%s213_s30 + $0x38] sm:$0xff]  ;;  %v227_v4 = vld [vmem:[%s213_s30 + $0x20] sm:$0xff]  ;;  %v228_v5 = vld [vmem:[%s213_s30 + $0x28] sm:$0xff]  ;;  %v251_v20 = vsel %vm249_vm2, %v245_v16, 0.0  ;;  %v252_v21 = vsel %vm248_vm3, %v237_v17, %v250_v19 }
  0x1b   : > { %v225_v6 = vld [vmem:[%s213_s30 + $0x10] sm:$0xff]  ;;  %v226_v7 = vld [vmem:[%s213_s30 + $0x18] sm:$0xff]  ;;  %v223_v8 = vld [vmem:[%s213_s30] sm:$0xff]  ;;  %v253_v22 = vsel %vm248_vm3, %v238_v18, %v251_v20 }
  0x1c   : > { %277 = vmatpush.msra.mxu0 %v229_v2  ;;  %297 = vmatpush.msra.mxu1 %v230_v3  ;;  %v224_v9 = vld [vmem:[%s213_s30 + $0x8] sm:$0xff]  ;;  %s508_s30 = scalar_lea.hbm %s507_s29, 16 }
  0x1d   : > { %p509_p12 = scmp.ne.s32.totalorder %s507_s29, %s508_s30  ;;  %p514_p2 = scmp.lt.s32.totalorder %s512_s6, %s508_s30 }
  0x1e   : > { %278 = vmatpush.msra.mxu0 %v227_v4  ;;  %298 = vmatpush.msra.mxu1 %v228_v5 }
  0x1f   : > { %p510_p13 = pnand %p509_p12, %p632_p4  ;;  %p515_p3 = por %p514_p2, %p513_p1 }
  0x20   : > { %279 = vmatpush.msra.mxu0 %v225_v6  ;;  %299 = vmatpush.msra.mxu1 %v226_v7 }
  0x21   : > { %p511_p0 = pneg %p510_p13 }
  0x22   : > { %280 = vmatpush.msra.mxu0 %v223_v8  ;;  %300 = vmatpush.msra.mxu1 %v224_v9 }
  0x23   : > { %427 = vmatmul.msk.f32.vlgmr.msra.gmra.mxu0 %vm254_vm1, %v222_v10  ;;  %429 = vmatmul.msk.f32.vlgmr.msra.gmra.mxu1 %vm254_vm1, %v222_v10  ;;  %p516_p5 = pnand %p515_p3, %p511_p0 }
  0xa0   : > { %v282_v23 = vpop.f32.mrf.mxu0  ;;  %v302_v24 = vpop.f32.mrf.mxu1 }
  0xa1   : > { %v283_v25 = vadd.f32 %v282_v23, %v252_v21  ;;  %v303_v26 = vadd.f32 %v302_v24, %v253_v22 }
  0xa3   : > { %305 = vst [vmem:[%s204_s26] sm:$0xff] %v283_v25 }
  0xa4   : > { %306 = vst [vmem:[%s204_s26 + $0x8] sm:$0xff] %v303_v26 }
  0xa5   : > { %519 = shalt.err (!%p516_p5)
}
  0xa6   : > { %437 = dma.vmem_to_hbm [thread:$0]  (%p632_p4), %s324_s27, 256, %s326_s28, %s308_s15  }
  0xa7 PF: > { %p443_p6 = scmp.ge.s32.totalorder %s570_s17, 2  ;;  %s337_s8 = sand.u32 1, %s550_s12  }
  0xa8   : > { %s338_s10 = scalar_lea.sflag [#allocation3], %s337_s8 }
  0xa9   : > { %p440_p7 = pnand %p443_p6, %p639_p8 }
  0xab   : > { %p441_p9 = pneg %p440_p7 }
  0xad   : > { %545 = dma.done.wait (%p441_p9), %s338_s10, 256  }
  0xae   : > { %547 = vsyncadd (%p441_p9), %s338_s10, 4294967040  ;;  %s16_s17 = sadd.s32 1, %s570_s17   ;;  %s704_s12 = smov %s554_s13 }
  0xaf   : > { %p13_p10 = scmp.ge.s32.totalorder %s16_s17, 4   ;;  %s705_s13 = smov %s558_s14 }
  0xb0   : > { %s706_s14 = smov %s645_s25  ;;  %s707_s15 = smov %s566_s16 }
  0xb1   : > { %s708_s16 = smov %s710_s20  ;;  %15 = sbr.rel (!%p13_p10) target bundleno = 4 (0x4), region = 71 }
  0xb6   :  { %344 = vsyncpa [#allocation3], 1 }
  0xb7   :  { %346 = vsyncpa [#allocation3 + $0x1], 1 }

</bundles_post_ra>
